<compile_context>
chip_gen: v7x
topology: tpu7x:2x2x1
jax: 0.10.0
libtpu: 0.0.40
codegen_flags: <defaults>
</compile_context>

<pallas_src>
import jax
import jax.numpy as jnp
from jax.experimental import pallas as pl
from jax.experimental.pallas import tpu as pltpu


def _conv1x1_kernel(x_ref, w_ref, b_ref, o_ref):
    # x_ref: (BN, Cin, TL)  w_ref: (Cout, Cin)  b_ref: (Cout, 1)  o_ref: (BN, Cout, TL)
    w = w_ref[...]
    b = b_ref[...]
    for i in range(x_ref.shape[0]):  # BN is small & static -> unrolled
        acc = jnp.dot(w, x_ref[i], preferred_element_type=jnp.float32)
        o_ref[i] = (acc + b).astype(o_ref.dtype)


_LANE = 128
_MAX_TL = 32768              # lane-tile cap; plenty to amortize ~0.35 us/step
_STEP_TARGET = 4 << 20       # target per-step activation payload (bytes)
_VMEM_BUDGET = 10 << 20      # double-buffered x+out blocks ceiling (fits the
                             # smallest scoped-VMEM default: 16 MiB on v5e)


def _largest_divisor_leq(n, k):
    k = max(1, min(n, k))
    for d in range(k, 0, -1):
        if n % d == 0:
            return d
    return 1


def _choose_tiles(N, Cin, Cout, L, itemsize):
    """Pick (BN, TL): batch rows per block and lane-tile width."""
    per_lane = (Cin + Cout) * itemsize  # bytes per lane across x-block + out-block

    # Largest lane tile (multiple of 128) whose double-buffered footprint fits.
    max_tl = max(_LANE, (_VMEM_BUDGET // (2 * per_lane)) // _LANE * _LANE)
    tl_cap = min(_MAX_TL, max_tl)
    if L <= tl_cap:
        tl = L                      # full dim: always layout-legal
    else:
        tl = tl_cap                 # multiple of 128; Pallas clips edge blocks

    # When L alone is thin, fold several batch rows into each step so each DMA
    # (and each output vst slab) stays fat; keep BN a divisor of N.
    step_bytes = per_lane * tl
    bn = 1
    if N > 1 and step_bytes < _STEP_TARGET:
        want = min(N, max(1, _STEP_TARGET // max(step_bytes, 1)))
        want = min(want, max(1, _VMEM_BUDGET // max(2 * step_bytes, 1)))
        bn = _largest_divisor_leq(N, want)

    # Keep >=2 grid steps along a parallel axis when possible so both v7x
    # TensorCores get work.
    grid_l = -(-L // tl)
    grid_n = N // bn
    if grid_n * grid_l < 2:
        if N >= 2:
            bn = _largest_divisor_leq(N, N // 2)
        elif L >= 2 * _LANE:
            tl = (((L + 1) // 2) + _LANE - 1) // _LANE * _LANE

    return bn, tl


def ae_forward(x, weight, bias):
    """1x1 Conv1d forward in NCL layout.

    x: (N, Cin, L); weight: (Cout, Cin, 1); bias: (Cout,). Returns (N, Cout, L).
    """
    N, Cin, L = x.shape
    Cout = weight.shape[0]

    wm = weight[:, :, 0]            # (Cout, Cin) — tiny, stays resident in VMEM
    bm = bias.reshape(Cout, 1)      # (Cout, 1) column, broadcast over lanes

    itemsize = jnp.dtype(x.dtype).itemsize
    BN, TL = _choose_tiles(N, Cin, Cout, L, itemsize)
    grid = (N // BN, pl.cdiv(L, TL))

    w_bytes = jnp.dtype(weight.dtype).itemsize * Cout * Cin
    b_bytes = jnp.dtype(bias.dtype).itemsize * Cout
    cost = pl.CostEstimate(
        flops=2 * N * L * Cin * Cout,
        transcendentals=0,
        bytes_accessed=itemsize * (N * Cin * L + N * Cout * L) + w_bytes + b_bytes,
    )

    out = pl.pallas_call(
        _conv1x1_kernel,
        out_shape=jax.ShapeDtypeStruct((N, Cout, L), x.dtype),
        grid=grid,
        in_specs=[
            # (BN, Cin, TL) activation block: L on the lane axis, BN rows/step.
            pl.BlockSpec((BN, Cin, TL), lambda n, l: (n, 0, l)),
            # Full weight / bias blocks, same block every grid step (resident).
            pl.BlockSpec((Cout, Cin), lambda n, l: (0, 0)),
            pl.BlockSpec((Cout, 1), lambda n, l: (0, 0)),
        ],
        out_specs=pl.BlockSpec((BN, Cout, TL), lambda n, l: (n, 0, l)),
        compiler_params=pltpu.CompilerParams(
            dimension_semantics=("parallel", "parallel"),
        ),
        cost_estimate=cost,
    )(x, wm, bm)

    return out


if __name__ == "__main__":
    key = jax.random.PRNGKey(0)
    k_x, k_w, k_b = jax.random.split(key, 3)

    # Small shapes consistent with the module: batch=2, n_in=4, n_out=8, seq=16
    N, n_in, n_out, L = 2, 4, 8, 16

    x = jax.random.normal(k_x, (N, n_in, L), dtype=jnp.float32)
    # Conv1d weight shape = (n_out, n_in, 1); deterministic synthetic init.
    weight = jax.random.normal(k_w, (n_out, n_in, 1), dtype=jnp.float32) * 0.1
    bias = jax.random.normal(k_b, (n_out,), dtype=jnp.float32) * 0.1

    out = ae_forward(x, weight, bias)
    out = jax.block_until_ready(out)

    # Correctness check vs. plain-JAX reference of the Conv1d(k=1) semantics.
    ref = jnp.einsum("ncl,oc->nol", x, weight[:, :, 0]) + bias[None, :, None]
    assert out.shape == (N, n_out, L)
    assert jnp.allclose(out, ref, atol=1e-5, rtol=1e-5)

    # A larger, perf-representative shape to exercise the big-TL / BN paths.
    N2, L2 = 4, 5000
    x2 = jax.random.normal(k_x, (N2, n_in, L2), dtype=jnp.float32)
    out2 = jax.block_until_ready(ae_forward(x2, weight, bias))
    ref2 = jnp.einsum("ncl,oc->nol", x2, weight[:, :, 0]) + bias[None, :, None]
    assert out2.shape == (N2, n_out, L2)
    assert jnp.allclose(out2, ref2, atol=1e-5, rtol=1e-5)

    print("KERNEL_OK")
</pallas_src>

<mosaic_0001>
module attributes {stable_mosaic.version = 11 : i64} {
  func.func @_conv1x1_kernel(%arg0: i32, %arg1: i32, %arg2: memref<1x4x16xf32, #tpu.memory_space<vmem>>, %arg3: memref<8x4xf32, #tpu.memory_space<vmem>>, %arg4: memref<8x1xf32, #tpu.memory_space<vmem>>, %arg5: memref<1x8x16xf32, #tpu.memory_space<vmem>>) attributes {dimension_semantics = [#tpu.dimension_semantics<parallel>, #tpu.dimension_semantics<parallel>], iteration_bounds = array<i64: 2, 1>, scalar_prefetch = 0 : i64, scratch_operands = 0 : i64, tpu.core_type = #tpu.core_type<tc>, window_params = [{transform_indices = @transform_0, window_bounds = array<i64: 1, 4, 16>}, {pipeline_mode = #tpu.pipeline_mode<synchronous>, transform_indices = @transform_1, window_bounds = array<i64: 8, 4>}, {pipeline_mode = #tpu.pipeline_mode<synchronous>, transform_indices = @transform_2, window_bounds = array<i64: 8, 1>}, {transform_indices = @transform_3, window_bounds = array<i64: 1, 8, 16>}]} {
    %c0 = arith.constant 0 : index
    %c0_0 = arith.constant 0 : index
    %0 = vector.load %arg3[%c0, %c0_0] : memref<8x4xf32, #tpu.memory_space<vmem>>, vector<8x4xf32>
    %c0_1 = arith.constant 0 : index
    %c0_2 = arith.constant 0 : index
    %1 = vector.load %arg4[%c0_1, %c0_2] : memref<8x1xf32, #tpu.memory_space<vmem>>, vector<8x1xf32>
    %c0_3 = arith.constant 0 : index
    %c0_4 = arith.constant 0 : index
    %c0_5 = arith.constant 0 : index
    %2 = vector.load %arg2[%c0_3, %c0_4, %c0_5] : memref<1x4x16xf32, #tpu.memory_space<vmem>>, vector<1x4x16xf32>
    %3 = vector.shape_cast %2 : vector<1x4x16xf32> to vector<4x16xf32>
    %cst = arith.constant dense<0.000000e+00> : vector<8x16xf32>
    %4 = tpu.matmul %0, %3, %cst {dimension_numbers = #tpu.dot_dimension_numbers<[1], [0], [0], [1], [0, 0, 1, 1], [], []>} : vector<8x4xf32>, vector<4x16xf32>, vector<8x16xf32> -> vector<8x16xf32>
    %5 = vector.broadcast %1 : vector<8x1xf32> to vector<8x16xf32>
    %6 = arith.addf %4, %5 : vector<8x16xf32>
    %c0_6 = arith.constant 0 : index
    %c0_7 = arith.constant 0 : index
    %c0_8 = arith.constant 0 : index
    %7 = vector.load %arg5[%c0_6, %c0_7, %c0_8] : memref<1x8x16xf32, #tpu.memory_space<vmem>>, vector<1x8x16xf32>
    %8 = vector.shape_cast %7 : vector<1x8x16xf32> to vector<8x16xf32>
    %9 = vector.shape_cast %6 : vector<8x16xf32> to vector<1x8x16xf32>
    tpu.vector_store %arg5[%c0_6, %c0_7, %c0_8], %9 {strides = array<i32>} : memref<1x8x16xf32, #tpu.memory_space<vmem>>, vector<1x8x16xf32>,
    return
  }
  func.func @transform_0(%arg0: i32, %arg1: i32) -> (i32, i32, i32) {
    %c0_i32 = arith.constant 0 : i32
    %c0_i32_0 = arith.constant 0 : i32
    return %arg0, %c0_i32, %arg1 : i32, i32, i32
  }
  func.func @transform_1(%arg0: i32, %arg1: i32) -> (i32, i32) {
    %c0_i32 = arith.constant 0 : i32
    %c0_i32_0 = arith.constant 0 : i32
    %c0_i32_1 = arith.constant 0 : i32
    return %c0_i32, %c0_i32_0 : i32, i32
  }
  func.func @transform_2(%arg0: i32, %arg1: i32) -> (i32, i32) {
    %c0_i32 = arith.constant 0 : i32
    %c0_i32_0 = arith.constant 0 : i32
    %c0_i32_1 = arith.constant 0 : i32
    return %c0_i32, %c0_i32_0 : i32, i32
  }
  func.func @transform_3(%arg0: i32, %arg1: i32) -> (i32, i32, i32) {
    %c0_i32 = arith.constant 0 : i32
    %c0_i32_0 = arith.constant 0 : i32
    return %arg0, %c0_i32, %arg1 : i32, i32, i32
  }
}

</mosaic_0001>

<bundles_post_ra>
// kernel: tpu_custom_call.1
= control target key start
LH: loop header
LB: loop body
LE: loop exit
PB: predicated region body
PF: predicated region fallthrough
CT: control target
= control target key end

     0   :  { %8 = vsyncpa [#allocation3], 0  ;;  %s666_s0 = inlined_call_operand.vmem [shape: f32[2,4,16], index: 0, kind: input, shape index: {}]   ;;  %s667_s1 = inlined_call_operand.vmem [shape: f32[8,4], index: 1, kind: input, shape index: {}]   ;;  %s668_s2 = inlined_call_operand.vmem [shape: f32[8,1], index: 2, kind: input, shape index: {}]   ;;  %s669_s3 = inlined_call_operand.hbm [shape: f32[2,8,16], index: 3, kind: output, shape index: {}]  }
   0x1   :  { %10 = vsyncpa [#allocation3 + $0x1], 0  ;;  %s548_s12 = smov 0   ;;  %s550_s13 = smov 0  }
   0x2   :  { %s552_s14 = smov 0   ;;  %s554_s15 = smov 0  }
   0x3   :  { %s556_s16 = smov 0   ;;  %s558_s17 = smov 0  }
   0x4 LB: > { %s365_s18 = sadd.s32 4294967295, %s522_s17   ;;  %s366_s19 = sadd.s32 4294967294, %s522_s17   ;;  %s522_s17 = sphi %s558_s17, %s16_s17   ;;  %s518_s16 = sphi %s556_s16, %s676_s16   ;;  %s514_s15 = sphi %s554_s15, %s675_s15   ;;  %s510_s14 = sphi %s552_s14, %s674_s14   ;;  %s506_s13 = sphi %s550_s13, %s673_s13   ;;  %s502_s12 = sphi %s548_s12, %s672_s12  }
   0x5   : > { %s28_s20 = sadd.s32 1, %s518_s16  ;;  %s107_s21 = sadd.s32 1, %s510_s14 }
   0x6   : > { %p30_p0 = scmp.ge.s32.totalorder %s28_s20, 2  ;;  %p117_p1 = scmp.ne.s32.totalorder %s510_s14, %s506_s13 }
   0x7   : > { %p118_p2 = scmp.eq.s32.totalorder %s365_s18, 1  ;;  %p123_p3 = scmp.ne.s32.totalorder %s506_s13, %s502_s12 }
   0x8   : > { %s678_s20 = smov (%p30_p0, %s28_s20), 0  ;;  %p124_p5 = scmp.eq.s32.totalorder %s366_s19, 1 }
   0x9   : > { %p588_p4 = por %p118_p2, %p117_p1  ;;  %s102_s23 = ssub.s32 %s518_s16, %s678_s20 }
   0xa   : > { %p369_p6 = scmp.ge.s32.totalorder %s522_s17, 1  ;;  %p105_p7 = scmp.eq.s32.totalorder %s102_s23, 0 }
   0xb   : > { %p595_p8 = por %p124_p5, %p123_p3  ;;  %p158_p9 = scmp.lt.s32.totalorder %s522_s17, 3 }
   0xc   : > { %s601_s25 = scalar_select %p105_p7, %s510_s14, %s107_s21  }
   0xd   : > { %p159_p10 = pnand %p369_p6, %p158_p9 }
   0xe   : > { %p184_p11 = scmp.lt.s32.totalorder (!%p159_p10), %s514_s15, 1  ;;  %v524_v0 = vmov (!%p159_p10), 0.0   ;;  %vm525_vm0 = vmmov (!%p159_p10), 0   ;;  %v192_v1 = vld [vmem:[%s668_s2] sm:$0xff] (!%p159_p10)  ;;  %v526_v2 = vmov (!%p159_p10), 0   ;;  %vm203_vm1 = vcmask (!%p159_p10), 1043456  }
   0xf   : > { %162 = sbr.rel (%p159_p10) target bundleno = 256 (0x100), region = 32  ;;  %380 = vmatprep.subr.mxu0 (!%p159_p10), %v524_v0  ;;  %382 = vmatprep.mubr.msk.f32.mxu0 (!%p159_p10), %vm525_vm0, %v524_v0  ;;  %v191_v3 = vld [vmem:[%s667_s1] sm:$0xff] (!%p159_p10)  ;;  %vm199_vm2 = vcmask (!%p159_p10), 31744   ;;  %s181_s8 = sand.u32 (!%p159_p10), 1, %s506_s13   ;;  %vm277_vm3 = vcmask (!%p159_p10), 130048  }
  0x10   : > { %443 = vset.pattern.permute.xlu0 (!%p159_p10), %v526_v2  ;;  %s370_s9 = sshll.u32 (!%p159_p10), %s181_s8, 3  ;;  %s375_s10 = sshll.u32 (!%p159_p10), %s514_s15, 7 }
  0x11   : > { %196 = vperm.xlu0 (!%p159_p10), %443, %v192_v1   ;;  %s183_s11 = scalar_lea.vmem (!%p159_p10), [#allocation2], %s370_s9  ;;  %s619_s23 = scalar_lea.hbm (!%p159_p10), %s669_s3, %s375_s10 }
  0x12   : > { %s294_s18 = sshll.u32 (!%p159_p10), %s183_s11, 4  ;;  %s280_s26 = scalar_lea.sflag (!%p159_p10), [#allocation3], %s181_s8  ;;  %s621_s18 = int_to_ptr.vmem [resolvable:$true] %s294_s18 }
  0x13   : > { %s444_s27 = scalar_lea.vmem (!%p159_p10), %s621_s18, 128 }
  0x14   : > { %p445_p12 = scmp.ne.s32.totalorder (!%p159_p10), %s621_s18, %s444_s27 }
  0x16   : > { %s185_s28 = scalar_select %p184_p11, %s514_s15, 1 }
  0x17   : > { %p446_p13 = pnand %p445_p12, %p588_p4  ;;  %s527_s15 = smov [#allocation2]  }
  0x18   : > { %s371_s29 = sshll.u32 %s185_s28, 2  ;;  %s448_s28 = sshll.u32 %s527_s15, 4  ;;  %s449_s28 = int_to_ptr.vmem [resolvable:$false] %s448_s28 }
  0x19   : > { %s190_s5 = scalar_lea.vmem %s666_s0, %s371_s29  ;;  %p447_p0 = pneg %p446_p13 }
  0x1a   : > { %v193_v4 = vld [vmem:[%s190_s5] sm:$0xf]  ;;  %s450_s29 = scalar_lea.vmem %s449_s28, 256  ;;  %p451_p1 = scmp.lt.s32.totalorder %s621_s18, %s449_s28 }
  0x1b   : > { %381 = vmatpush3.msk.msra.mxu0 %vm203_vm1, %v193_v4  ;;  %p452_p2 = scmp.lt.s32.totalorder %s450_s29, %s444_s27 }
  0x1c   : > { %383 = vmatmul.mubr.msk.f32.vlgmr.msra.gmra.mrb[0].mxu0 %vm199_vm2, %v191_v3 }
  0x1d   : > { %p453_p3 = por %p452_p2, %p451_p1 }
  0x1f   : > { %p454_p5 = pnand %p453_p3, %p447_p0 }
  0x90   : > { %v197_v5 = vpop.permute.xlu0 %196 }
  0xef   : > { %v273_v6 = vpop.f32.mrb[0].mxu0 }
  0xf0   : > { %v274_v7 = vadd.f32 %v273_v6, %v197_v5  ;;  %v384_v8 = vpop.f32.mrb[1].mxu0 }
  0xf2   : > { %278 = vst.msk [vmem:[%s183_s11] sm:$0xff] %vm277_vm3, %v274_v7 }
  0xf3   : > { %457 = shalt.err (!%p454_p5)
}
  0xf4   : > { %s458_s30 = scalar_lea.hbm %s619_s23, 128  ;;  %s462_s6 = scalar_lea.hbm %s669_s3, 256 }
  0xf5   : > { %p459_p6 = scmp.ne.s32.totalorder %s619_s23, %s458_s30  ;;  %p463_p10 = scmp.lt.u32.totalorder %s619_s23, %s669_s3 }
  0xf6   : > { %p464_p11 = scmp.lt.u32.totalorder %s462_s6, %s458_s30  ;;  %p466_p13 = scmp.lt.u32.totalorder %s458_s30, %s619_s23 }
  0xf7   : > { %p460_p7 = pnand %p459_p6, %p588_p4 }
  0xf8   : > { %p465_p12 = por %p464_p11, %p463_p10 }
  0xf9   : > { %p461_p9 = pneg %p460_p7 }
  0xfa   : > { %p467_p0 = por %p466_p13, %p465_p12 }
  0xfc   : > { %p468_p1 = pnand %p467_p0, %p461_p9 }
  0xfe   : > { %471 = shalt.err (!%p468_p1)
}
  0xff   : > { %385 = dma.vmem_to_hbm [thread:$0]  (%p588_p4), %s621_s18, 128, %s619_s23, %s280_s26  }
 0x100 PF: > { %p391_p2 = scmp.ge.s32.totalorder %s522_s17, 2  ;;  %s306_s9 = sand.u32 1, %s502_s12  }
 0x101   : > { %s307_s10 = scalar_lea.sflag [#allocation3], %s306_s9 }
 0x102   : > { %p388_p3 = pnand %p391_p2, %p595_p8 }
 0x104   : > { %497 = dma.done.wait (!%p388_p3), %s307_s10, 128  }
 0x105   : > { %499 = vsyncadd (!%p388_p3), %s307_s10, 4294967168  ;;  %s16_s17 = sadd.s32 1, %s522_s17   ;;  %s672_s12 = smov %s506_s13 }
 0x106   : > { %p13_p5 = scmp.ge.s32.totalorder %s16_s17, 4   ;;  %s673_s13 = smov %s510_s14 }
 0x107   : > { %s674_s14 = smov %s601_s25  ;;  %s675_s15 = smov %s518_s16 }
 0x108   : > { %s676_s16 = smov %s678_s20  ;;  %15 = sbr.rel (!%p13_p5) target bundleno = 4 (0x4), region = 67 }
 0x10f   :  { %312 = vsyncpa [#allocation3], 1 }
 0x110   :  { %314 = vsyncpa [#allocation3 + $0x1], 1 }

</bundles_post_ra>
